<compile_context>
chip_gen: v7x
topology: tpu7x:2x2x1
jax: 0.10.0
libtpu: 0.0.40
codegen_flags: <defaults>
</compile_context>

<pallas_src>
import jax
import jax.numpy as jnp
from jax import lax
from jax.experimental import pallas as pl
from jax.experimental.pallas import tpu as pltpu

batch_size = 1
hidden_size = 5
input_size = 5
num_classes = 5
num_layers = 1
sequence_length = 1

_LANE = 128


def _round_up(n, m):
    return ((n + m - 1) // m) * m


def rnn_kernel(x_ref, h0_ref, wih_ref, whh_ref, b_ref, out_ref):
    """Sequential tanh RNN; hidden state lives in the fori_loop carry (vregs).

    x_ref:   (S*B, Ip)   time-major (t fastest over rows of B), lane-padded
    h0_ref:  (B, Hp)     lane-padded initial hidden
    wih_ref: (Ip, Hp)    W_ih^T, zero-padded
    whh_ref: (Hp, Hp)    W_hh^T, zero-padded
    b_ref:   (1, Hp)     b_ih + b_hh, zero-padded
    out_ref: (S*B, Hp)   per-step hidden states (lane-dense)
    """
    # Hoisted: weights / bias loaded exactly once.
    w_ih = wih_ref[...]                                  # (Ip, Hp) f32
    w_hh = whh_ref[...]                                  # (Hp, Hp) f32
    b = b_ref[...]                                       # (1, Hp)  f32

    B = h0_ref.shape[0]
    S = x_ref.shape[0] // B

    # Parallel part: one MXU matmul for all time steps' input projections,
    # written straight into the output buffer.
    out_ref[...] = (
        jnp.dot(x_ref[...].astype(jnp.float32), w_ih,
                preferred_element_type=jnp.float32) + b
    )

    # Sequential part: only the recurrence h @ W_hh^T + tanh per step.
    def step(t, h):
        rows = pl.ds(t * B, B)
        pre = out_ref[rows, :]                           # x_t proj + bias
        h_new = jnp.tanh(
            pre + jnp.dot(h, w_hh, preferred_element_type=jnp.float32)
        )                                                # (B, Hp)
        out_ref[rows, :] = h_new.astype(out_ref.dtype)
        return h_new                                     # carry stays in vregs

    h0 = h0_ref[...].astype(jnp.float32)
    lax.fori_loop(0, S, step, h0, unroll=min(int(S), 8))


def rnn_forward(x, hidden, w_ih, w_hh, b_ih, b_hh):
    """Mirrors Model.forward(x, hidden) -> (hidden, out)."""
    x = x.reshape(batch_size, sequence_length, input_size)
    B, S, I = x.shape
    H = w_ih.shape[0]
    Ip = _round_up(I, _LANE)
    Hp = _round_up(H, _LANE)

    # Lane-dense, time-major input (flattened to 2D rows = S*B) and hidden.
    x_tm = jnp.transpose(x, (1, 0, 2)).astype(jnp.float32)              # (S, B, I)
    x_tm = jnp.pad(x_tm, ((0, 0), (0, 0), (0, Ip - I)))                 # (S, B, Ip)
    x_2d = x_tm.reshape(S * B, Ip)                                      # (S*B, Ip)
    h0 = jnp.pad(hidden[0].astype(jnp.float32), ((0, 0), (0, Hp - H)))  # (B, Hp)

    # Pre-transposed, zero-padded weights and fused bias. Padded rows/cols are
    # zero so padded hidden lanes stay exactly 0 every step.
    wih_p = jnp.zeros((Ip, Hp), jnp.float32).at[:I, :H].set(
        jnp.transpose(w_ih).astype(jnp.float32))
    whh_p = jnp.zeros((Hp, Hp), jnp.float32).at[:H, :H].set(
        jnp.transpose(w_hh).astype(jnp.float32))
    bias = jnp.zeros((1, Hp), jnp.float32).at[0, :H].set(
        (b_ih + b_hh).astype(jnp.float32))

    out_2d = pl.pallas_call(
        rnn_kernel,
        out_shape=jax.ShapeDtypeStruct((S * B, Hp), jnp.float32),
        in_specs=[
            pl.BlockSpec(memory_space=pltpu.MemorySpace.VMEM),  # x    (S*B, Ip)
            pl.BlockSpec(memory_space=pltpu.MemorySpace.VMEM),  # h0   (B, Hp)
            pl.BlockSpec(memory_space=pltpu.MemorySpace.VMEM),  # Wih  (Ip, Hp)
            pl.BlockSpec(memory_space=pltpu.MemorySpace.VMEM),  # Whh  (Hp, Hp)
            pl.BlockSpec(memory_space=pltpu.MemorySpace.VMEM),  # b    (1, Hp)
        ],
        out_specs=pl.BlockSpec(memory_space=pltpu.MemorySpace.VMEM),
    )(x_2d, h0, wih_p, whh_p, bias)

    # Strip padding / restore batch_first outside the kernel.
    out_tm = out_2d.reshape(S, B, Hp)[:, :, :H]                         # (S, B, H)
    out = jnp.transpose(out_tm, (1, 0, 2)).astype(x.dtype)              # (B, S, H)
    hidden_out = out_tm[-1].astype(x.dtype)[None]                       # (1, B, H)
    # NOTE: matches PyTorch out.view(-1, num_classes); assumes H == num_classes.
    out_flat = out.reshape(-1, num_classes)
    return hidden_out, out_flat


def ref_forward(x, hidden, w_ih, w_hh, b_ih, b_hh):
    """Pure-JAX reference of the PyTorch nn.RNN forward (tanh, 1 layer)."""
    x = x.reshape(batch_size, sequence_length, input_size)
    h = hidden[0]
    outs = []
    for t in range(sequence_length):
        h = jnp.tanh(x[:, t, :] @ w_ih.T + b_ih + h @ w_hh.T + b_hh)
        outs.append(h)
    out = jnp.stack(outs, axis=1)
    return h[None], out.reshape(-1, num_classes)


if __name__ == "__main__":
    key = jax.random.PRNGKey(0)
    kx, kh, k1, k2, k3, k4 = jax.random.split(key, 6)

    # Deterministic parameter init (matches PyTorch U(-1/sqrt(H), 1/sqrt(H)) ranges).
    bound = 1.0 / (hidden_size ** 0.5)
    w_ih = jax.random.uniform(k1, (hidden_size, input_size), jnp.float32, -bound, bound)
    w_hh = jax.random.uniform(k2, (hidden_size, hidden_size), jnp.float32, -bound, bound)
    b_ih = jax.random.uniform(k3, (hidden_size,), jnp.float32, -bound, bound)
    b_hh = jax.random.uniform(k4, (hidden_size,), jnp.float32, -bound, bound)

    # Example inputs consistent with the module (non-zero hidden exercises W_hh path).
    x = jax.random.normal(kx, (batch_size, sequence_length, input_size), jnp.float32)
    hidden = 0.1 * jax.random.normal(
        kh, (num_layers, batch_size, hidden_size), jnp.float32)

    hidden_out, out = jax.jit(rnn_forward)(x, hidden, w_ih, w_hh, b_ih, b_hh)
    jax.block_until_ready((hidden_out, out))

    hid_ref, out_ref = ref_forward(x, hidden, w_ih, w_hh, b_ih, b_hh)
    assert hidden_out.shape == (num_layers, batch_size, hidden_size)
    assert out.shape == (batch_size * sequence_length, num_classes)
    assert jnp.allclose(hidden_out, hid_ref, atol=1e-5)
    assert jnp.allclose(out, out_ref, atol=1e-5)

    print("KERNEL_OK")
</pallas_src>

<mosaic_0001>
module attributes {stable_mosaic.version = 11 : i64} {
  func.func @rnn_kernel(%arg0: memref<1x128xf32, #tpu.memory_space<vmem>>, %arg1: memref<1x128xf32, #tpu.memory_space<vmem>>, %arg2: memref<128x128xf32, #tpu.memory_space<vmem>>, %arg3: memref<128x128xf32, #tpu.memory_space<vmem>>, %arg4: memref<1x128xf32, #tpu.memory_space<vmem>>, %arg5: memref<1x128xf32, #tpu.memory_space<vmem>>) attributes {dimension_semantics = [], scalar_prefetch = 0 : i64, scratch_operands = 0 : i64, tpu.core_type = #tpu.core_type<tc>} {
    %c0 = arith.constant 0 : index
    %c0_0 = arith.constant 0 : index
    %0 = vector.load %arg2[%c0, %c0_0] : memref<128x128xf32, #tpu.memory_space<vmem>>, vector<128x128xf32>
    %c0_1 = arith.constant 0 : index
    %c0_2 = arith.constant 0 : index
    %1 = vector.load %arg3[%c0_1, %c0_2] : memref<128x128xf32, #tpu.memory_space<vmem>>, vector<128x128xf32>
    %c0_3 = arith.constant 0 : index
    %c0_4 = arith.constant 0 : index
    %2 = vector.load %arg4[%c0_3, %c0_4] : memref<1x128xf32, #tpu.memory_space<vmem>>, vector<1x128xf32>
    %c0_5 = arith.constant 0 : index
    %c0_6 = arith.constant 0 : index
    %3 = vector.load %arg0[%c0_5, %c0_6] : memref<1x128xf32, #tpu.memory_space<vmem>>, vector<1x128xf32>
    %cst = arith.constant dense<0.000000e+00> : vector<1x128xf32>
    %4 = tpu.matmul %3, %0, %cst {dimension_numbers = #tpu.dot_dimension_numbers<[1], [0], [0], [1], [0, 0, 1, 1], [], []>} : vector<1x128xf32>, vector<128x128xf32>, vector<1x128xf32> -> vector<1x128xf32>
    %5 = arith.addf %4, %2 : vector<1x128xf32>
    %c0_7 = arith.constant 0 : index
    %c0_8 = arith.constant 0 : index
    %6 = vector.load %arg5[%c0_7, %c0_8] : memref<1x128xf32, #tpu.memory_space<vmem>>, vector<1x128xf32>
    tpu.vector_store %arg5[%c0_7, %c0_8], %5 {strides = array<i32>} : memref<1x128xf32, #tpu.memory_space<vmem>>, vector<1x128xf32>,
    %c0_9 = arith.constant 0 : index
    %c0_10 = arith.constant 0 : index
    %7 = vector.load %arg1[%c0_9, %c0_10] : memref<1x128xf32, #tpu.memory_space<vmem>>, vector<1x128xf32>
    %c0_i32 = arith.constant 0 : i32
    %c1_i32 = arith.constant 1 : i32
    %8 = arith.muli %c0_i32, %c1_i32 : i32
    %9 = arith.index_cast %8 : i32 to index
    %c0_11 = arith.constant 0 : index
    %10 = vector.load %arg5[%9, %c0_11] : memref<1x128xf32, #tpu.memory_space<vmem>>, vector<1x128xf32>
    %cst_12 = arith.constant dense<0.000000e+00> : vector<1x128xf32>
    %11 = tpu.matmul %7, %1, %cst_12 {dimension_numbers = #tpu.dot_dimension_numbers<[1], [0], [0], [1], [0, 0, 1, 1], [], []>} : vector<1x128xf32>, vector<128x128xf32>, vector<1x128xf32> -> vector<1x128xf32>
    %12 = arith.addf %10, %11 : vector<1x128xf32>
    %13 = math.tanh %12 : vector<1x128xf32>
    %14 = arith.index_cast %8 : i32 to index
    %c0_13 = arith.constant 0 : index
    %15 = vector.load %arg5[%14, %c0_13] : memref<1x128xf32, #tpu.memory_space<vmem>>, vector<1x128xf32>
    tpu.vector_store %arg5[%14, %c0_13], %13 {strides = array<i32>} : memref<1x128xf32, #tpu.memory_space<vmem>>, vector<1x128xf32>,
    %c1_i32_14 = arith.constant 1 : i32
    return
  }
}

</mosaic_0001>

<bundles_post_ra>
// kernel: rnn_forward.1
= control target key start
LH: loop header
LB: loop body
LE: loop exit
PB: predicated region body
PF: predicated region fallthrough
CT: control target
= control target key end

     0   :  { %v361_v0 = vmov 0.0|0.0   ;;  %vm362_vm0 = vmmov 0   ;;  %v363_v6 = vmov 0.0   ;;  %s524_s2 = inlined_call_operand.vmem [shape: f32[128,128], index: 2, kind: input, shape index: {}]   ;;  %s525_s3 = inlined_call_operand.vmem [shape: f32[128,128], index: 3, kind: input, shape index: {}]   ;;  %s526_s0 = inlined_call_operand.vmem [shape: f32[1,128], index: 0, kind: input, shape index: {}]   ;;  %s527_s1 = inlined_call_operand.vmem [shape: f32[1,128], index: 1, kind: input, shape index: {}]   ;;  %s528_s4 = inlined_call_operand.vmem [shape: f32[1,128], index: 4, kind: input, shape index: {}]   ;;  %s529_s5 = inlined_call_operand.vmem [shape: f32[1,128], index: 5, kind: output, shape index: {}]  }
   0x1   :  { %308 = vmatprep.subr.bf16.mxu0 %v361_v0  ;;  %v20_v1 = vld [vmem:[%s524_s2] sm:$0xff]  ;;  %v21_v2 = vld [vmem:[%s524_s2 + $0x8] sm:$0xff]  ;;  %v22_v3 = vld [vmem:[%s524_s2 + $0x10] sm:$0xff]  ;;  %332 = vmatprep.subr.bf16.mxu1 %v361_v0 }
   0x2   :  { %v309_v4 = vpack.c.bf16 %v21_v2, %v20_v1  ;;  %v23_v5 = vld [vmem:[%s524_s2 + $0x18] sm:$0xff]  ;;  %270 = vmatprep.mubr.msk.f32.mxu0 %vm362_vm0, %v363_v6  ;;  %305 = vmatprep.mubr.msk.f32.mxu1 %vm362_vm0, %v363_v6  ;;  %v36_v7 = vld [vmem:[%s525_s3] sm:$0xff]  ;;  %v37_v8 = vld [vmem:[%s525_s3 + $0x8] sm:$0xff] }
   0x3   :  { %v312_v9 = vpack.c.bf16 %v23_v5, %v22_v3  ;;  %v333_v10 = vpack.c.bf16 %v37_v8, %v36_v7  ;;  %v38_v11 = vld [vmem:[%s525_s3 + $0x10] sm:$0xff]  ;;  %v39_v12 = vld [vmem:[%s525_s3 + $0x18] sm:$0xff]  ;;  %v24_v13 = vld [vmem:[%s524_s2 + $0x20] sm:$0xff] }
   0x4   :  { %310 = vmatpush3.bf16.msra.mxu0 %v309_v4  ;;  %v25_v14 = vld [vmem:[%s524_s2 + $0x28] sm:$0xff]  ;;  %v336_v15 = vpack.c.bf16 %v39_v12, %v38_v11  ;;  %v40_v16 = vld [vmem:[%s525_s3 + $0x20] sm:$0xff]  ;;  %v26_v19 = vld [vmem:[%s524_s2 + $0x30] sm:$0xff] }
   0x5   :  { %311 = vmatprep.subr.bf16.mxu0 %v361_v0  ;;  %334 = vmatpush3.bf16.msra.mxu1 %v333_v10  ;;  %v41_v17 = vld [vmem:[%s525_s3 + $0x28] sm:$0xff]  ;;  %v315_v18 = vpack.c.bf16 %v25_v14, %v24_v13  ;;  %v27_v20 = vld [vmem:[%s524_s2 + $0x38] sm:$0xff]  ;;  %v42_v22 = vld [vmem:[%s525_s3 + $0x30] sm:$0xff] }
   0x6   :  { %335 = vmatprep.subr.bf16.mxu1 %v361_v0  ;;  %v339_v21 = vpack.c.bf16 %v41_v17, %v40_v16  ;;  %v43_v23 = vld [vmem:[%s525_s3 + $0x38] sm:$0xff]  ;;  %v318_v24 = vpack.c.bf16 %v27_v20, %v26_v19  ;;  %v28_v25 = vld [vmem:[%s524_s2 + $0x40] sm:$0xff]  ;;  %v29_v26 = vld [vmem:[%s524_s2 + $0x48] sm:$0xff] }
   0x7   :  { %v342_v27 = vpack.c.bf16 %v43_v23, %v42_v22  ;;  %v44_v28 = vld [vmem:[%s525_s3 + $0x40] sm:$0xff]  ;;  %v45_v29 = vld [vmem:[%s525_s3 + $0x48] sm:$0xff]  ;;  %v321_v30 = vpack.c.bf16 %v29_v26, %v28_v25  ;;  %v30_v31 = vld [vmem:[%s524_s2 + $0x50] sm:$0xff] }
   0x8   :  { %313 = vmatpush3.bf16.msra.mxu0 %v312_v9  ;;  %v31_v32 = vld [vmem:[%s524_s2 + $0x58] sm:$0xff]  ;;  %v345_v33 = vpack.c.bf16 %v45_v29, %v44_v28  ;;  %v46_v34 = vld [vmem:[%s525_s3 + $0x50] sm:$0xff]  ;;  %v32_v37 = vld [vmem:[%s524_s2 + $0x60] sm:$0xff] }
   0x9   :  { %314 = vmatprep.subr.bf16.mxu0 %v361_v0  ;;  %337 = vmatpush3.bf16.msra.mxu1 %v336_v15  ;;  %v47_v35 = vld [vmem:[%s525_s3 + $0x58] sm:$0xff]  ;;  %v324_v36 = vpack.c.bf16 %v31_v32, %v30_v31  ;;  %v33_v38 = vld [vmem:[%s524_s2 + $0x68] sm:$0xff]  ;;  %v48_v40 = vld [vmem:[%s525_s3 + $0x60] sm:$0xff] }
   0xa   :  { %338 = vmatprep.subr.bf16.mxu1 %v361_v0  ;;  %v348_v39 = vpack.c.bf16 %v47_v35, %v46_v34  ;;  %v49_v41 = vld [vmem:[%s525_s3 + $0x68] sm:$0xff]  ;;  %v327_v42 = vpack.c.bf16 %v33_v38, %v32_v37  ;;  %v34_v43 = vld [vmem:[%s524_s2 + $0x70] sm:$0xff]  ;;  %v35_v44 = vld [vmem:[%s524_s2 + $0x78] sm:$0xff] }
   0xb   :  { %v351_v45 = vpack.c.bf16 %v49_v41, %v48_v40  ;;  %v50_v46 = vld [vmem:[%s525_s3 + $0x70] sm:$0xff]  ;;  %v51_v47 = vld [vmem:[%s525_s3 + $0x78] sm:$0xff]  ;;  %v330_v48 = vpack.c.bf16 %v35_v44, %v34_v43  ;;  %v53_v50 = vld [vmem:[%s526_s0] sm:$0x1] }
   0xc   :  { %316 = vmatpush3.bf16.msra.mxu0 %v315_v18  ;;  %v354_v49 = vpack.c.bf16 %v51_v47, %v50_v46  ;;  %v125_v51 = vld [vmem:[%s527_s1] sm:$0x1] }
   0xd   :  { %317 = vmatprep.subr.bf16.mxu0 %v361_v0  ;;  %340 = vmatpush3.bf16.msra.mxu1 %v339_v21  ;;  %v52_v52 = vld [vmem:[%s528_s4] sm:$0x1] }
   0xe   :  { %341 = vmatprep.subr.bf16.mxu1 %v361_v0 }
  0x10   :  { %319 = vmatpush3.bf16.msra.mxu0 %v318_v24 }
  0x11   :  { %320 = vmatprep.subr.bf16.mxu0 %v361_v0  ;;  %343 = vmatpush3.bf16.msra.mxu1 %v342_v27 }
  0x12   :  { %344 = vmatprep.subr.bf16.mxu1 %v361_v0 }
  0x14   :  { %322 = vmatpush3.bf16.msra.mxu0 %v321_v30 }
  0x15   :  { %323 = vmatprep.subr.bf16.mxu0 %v361_v0  ;;  %346 = vmatpush3.bf16.msra.mxu1 %v345_v33 }
  0x16   :  { %347 = vmatprep.subr.bf16.mxu1 %v361_v0 }
  0x18   :  { %325 = vmatpush3.bf16.msra.mxu0 %v324_v36 }
  0x19   :  { %326 = vmatprep.subr.bf16.mxu0 %v361_v0  ;;  %349 = vmatpush3.bf16.msra.mxu1 %v348_v39 }
  0x1a   :  { %350 = vmatprep.subr.bf16.mxu1 %v361_v0 }
  0x1c   :  { %328 = vmatpush3.bf16.msra.mxu0 %v327_v42 }
  0x1d   :  { %329 = vmatprep.subr.bf16.mxu0 %v361_v0  ;;  %352 = vmatpush3.bf16.msra.mxu1 %v351_v45 }
  0x1e   :  { %353 = vmatprep.subr.bf16.mxu1 %v361_v0 }
  0x20   :  { %331 = vmatpush3.bf16.msra.mxu0 %v330_v48 }
  0x21   :  { %355 = vmatpush3.bf16.msra.mxu1 %v354_v49 }
  0x23   :  { %271 = vmatmul.mubr.f32.vlgmr.msra.gmra.mrb[0].mxu0 %v53_v50 }
  0x24   :  { %306 = vmatmul.mubr.f32.vlgmr.msra.gmra.mrb[0].mxu1 %v125_v51 }
  0xf6   :  { %v120_v53 = vpop.f32.mrb[0].mxu0 }
  0xf7   :  { %v121_v54 = vadd.f32 %v120_v53, %v52_v52  ;;  %v272_v55 = vpop.f32.mrb[1].mxu0  ;;  %v193_v56 = vpop.f32.mrb[0].mxu1 }
  0xf8   :  { %v307_v57 = vpop.f32.mrb[1].mxu1 }
  0xf9   :  { %124 = vst [vmem:[%s529_s5] sm:$0x1] %v121_v54 }
 0x100   :  { %v126_v58 = vld [vmem:[%s529_s5] sm:$0x1] }
 0x101   :  { %v197_v59 = vadd.f32 %v193_v56, %v126_v58 }
 0x103   :  { %359 = vtanh.f32 %v197_v59 }
 0x10d   :  { %v360_v60 = vpop.eup %359 }
 0x10e   :  { %199 = vst [vmem:[%s529_s5] sm:$0x1] %v360_v60 }

</bundles_post_ra>
